<compile_context>
chip_gen: v5e
topology: v5e:2x2
jax: 0.10.0
libtpu: 0.0.40
codegen_flags: <defaults>
</compile_context>

<pallas_src>
import jax
import jax.numpy as jnp
from jax.experimental import pallas as pl
from jax.experimental.pallas import tpu as pltpu


def _make_max_pool_kernel(we):
    """`we` = width (in lanes) of one image row inside a pooling band."""

    def kernel(x_ref, s_ref, o_ref):
        # x_ref: (Rb, Lin)          -- F bands per row, band f at lanes
        #                              [f*2*we, (f+1)*2*we).
        # s_ref: (Lin - we - 1, Lout) -- 0/1 lane-selection matrix (resident).
        # o_ref: (Rb, Lout)         -- Lout = F*Wo pooled outputs (lane-dense).
        x = x_ref[...]
        lin = x.shape[-1]
        # H-direction max (VPU): the partner image row of every 2x2 window sits
        # `we` lanes to the right within the same kernel row.
        u = jnp.maximum(x[:, : lin - we], x[:, we:])
        # W-direction pair max (VPU): the partner column is the next lane.
        m = jnp.maximum(u[:, :-1], u[:, 1:])
        # Compact the wanted lanes (one per output) with a single 0/1 selection
        # matmul on the MXU -- avoids lane-strided XLU gathers.
        # TODO(synk): use precision=jax.lax.Precision.HIGHEST if bit-exact
        # selection is required; default keeps the compaction under the MXU
        # roofline on v5e/v7x and already matches f32 to <1e-5.
        o_ref[...] = jnp.dot(
            m, s_ref[...], preferred_element_type=jnp.float32
        ).astype(o_ref.dtype)

    return kernel


def _pick_fold(num_bands, wo):
    """Bands folded per kernel row: F | num_bands, F*wo >= 128 (lane-dense
    stores) when reachable, F*wo <= 256 (bounds selection matrix / MXU work)."""
    if wo >= 128:
        return 1
    target = -(-128 // wo)                        # ceil(128 / wo)
    fmax = max(1, min(num_bands, 256 // wo))
    best = 1
    for f in range(1, fmax + 1):
        if num_bands % f:
            continue
        best = f
        if f >= target:
            return f                              # smallest divisor reaching 128 lanes
    return best                                   # largest divisor under the cap


def _pick_rows_per_block(total_rows, row_bytes, itemsize, budget_bytes=4 << 20):
    """Rows per grid block: divides total_rows, multiple of the sublane
    quantum, fits a ~4 MiB input budget (v7x 64 MiB VMEM safe with
    double-buffered in+out), keeps >= 4 grid steps when affordable."""
    sub = max(8, 32 // max(1, itemsize))          # 8 (f32) / 16 (bf16) / 32 (i8)
    cap = max(1, min(total_rows, budget_bytes // max(1, row_bytes)))
    if total_rows >= 4 * sub:
        cap = min(cap, max(sub, total_rows // 4))
    cap -= cap % sub
    while cap >= sub:
        if total_rows % cap == 0:
            return cap
        cap -= sub
    # No sublane-aligned divisor fits the budget: fall back to the full extent
    # (always a legal block; only hit for tiny / pathological row counts).
    return total_rows


def max_pool2d_pallas(x):
    """F.max_pool2d(x, kernel_size=2, stride=2) for NCHW float input."""
    N, C, H, W = x.shape
    Ho, Wo = H // 2, W // 2
    assert Ho > 0 and Wo > 0, "spatial dims must be >= 2"
    if (H % 2) or (W % 2):
        # PyTorch floors the output size: drop the trailing row / column.
        # TODO(synk): mask inside the kernel instead to avoid this HBM copy.
        x = x[:, :, : 2 * Ho, : 2 * Wo]
    We = 2 * Wo

    num_bands = N * C * Ho                        # independent 2-row pooling bands
    fold = _pick_fold(num_bands, Wo)
    total_rows = num_bands // fold
    lin = fold * 2 * We                           # input lanes per kernel row
    lout = fold * Wo                              # output lanes per kernel row
    kc = lin - We - 1                             # contraction length after slicing

    itemsize = jnp.dtype(x.dtype).itemsize
    rb = _pick_rows_per_block(total_rows, lin * itemsize, itemsize)
    grid = (total_rows // rb,)

    # Free, contiguous reshape: row r packs `fold` consecutive bands back-to-back.
    xr = x.reshape(total_rows, lin)

    # 0/1 selection matrix: output column j wants lane 2*We*(j//Wo) + 2*(j%Wo)
    # of the pair-maxed row.  Built once outside the kernel and fetched into
    # VMEM a single time (its block index never changes across the grid).
    kk = jnp.arange(kc, dtype=jnp.int32)[:, None]
    jj = jnp.arange(lout, dtype=jnp.int32)[None, :]
    sel = (kk == 2 * We * (jj // Wo) + 2 * (jj % Wo)).astype(x.dtype)

    out = pl.pallas_call(
        _make_max_pool_kernel(We),
        out_shape=jax.ShapeDtypeStruct((total_rows, lout), x.dtype),
        grid=grid,
        in_specs=[
            pl.BlockSpec((rb, lin), lambda i: (i, 0)),
            pl.BlockSpec((kc, lout), lambda i: (0, 0)),   # resident across steps
        ],
        out_specs=pl.BlockSpec((rb, lout), lambda i: (i, 0)),
        compiler_params=pltpu.CompilerParams(
            dimension_semantics=("parallel",)),
    )(xr, sel)

    return out.reshape(N, C, Ho, Wo)


def _max_pool2d_ref(x):
    N, C, H, W = x.shape
    xe = x[:, :, : H // 2 * 2, : W // 2 * 2]
    return xe.reshape(N, C, H // 2, 2, W // 2, 2).max(axis=(3, 5))


if __name__ == "__main__":
    key = jax.random.PRNGKey(0)
    x = jax.random.normal(key, (2, 4, 16, 16), dtype=jnp.float32)  # NCHW

    y = max_pool2d_pallas(x)
    y = jax.block_until_ready(y)

    y_ref = _max_pool2d_ref(x)
    assert y.shape == (2, 4, 8, 8), y.shape
    assert jnp.allclose(y, y_ref, atol=1e-5, rtol=1e-5), "mismatch vs reference"

    print("KERNEL_OK")
</pallas_src>

<mosaic_0001>
module attributes {stable_mosaic.version = 11 : i64} {
  func.func @kernel(%arg0: i32, %arg1: memref<4x512xf32, #tpu.memory_space<vmem>>, %arg2: memref<495x128xf32, #tpu.memory_space<vmem>>, %arg3: memref<4x128xf32, #tpu.memory_space<vmem>>) attributes {dimension_semantics = [#tpu.dimension_semantics<parallel>], iteration_bounds = array<i64: 1>, scalar_prefetch = 0 : i64, scratch_operands = 0 : i64, tpu.core_type = #tpu.core_type<tc>, window_params = [{transform_indices = @transform_0, window_bounds = array<i64: 4, 512>}, {pipeline_mode = #tpu.pipeline_mode<synchronous>, transform_indices = @transform_1, window_bounds = array<i64: 495, 128>}, {transform_indices = @transform_2, window_bounds = array<i64: 4, 128>}]} {
    %c0 = arith.constant 0 : index
    %c0_0 = arith.constant 0 : index
    %0 = vector.load %arg1[%c0, %c0_0] : memref<4x512xf32, #tpu.memory_space<vmem>>, vector<4x512xf32>
    %1 = vector.extract_strided_slice %0 {offsets = [0, 0], sizes = [4, 496], strides = [1, 1]} : vector<4x512xf32> to vector<4x496xf32>
    %2 = vector.extract_strided_slice %0 {offsets = [0, 16], sizes = [4, 496], strides = [1, 1]} : vector<4x512xf32> to vector<4x496xf32>
    %3 = arith.maximumf %1, %2 : vector<4x496xf32>
    %4 = vector.extract_strided_slice %3 {offsets = [0, 0], sizes = [4, 495], strides = [1, 1]} : vector<4x496xf32> to vector<4x495xf32>
    %5 = vector.extract_strided_slice %3 {offsets = [0, 1], sizes = [4, 495], strides = [1, 1]} : vector<4x496xf32> to vector<4x495xf32>
    %6 = arith.maximumf %4, %5 : vector<4x495xf32>
    %c0_1 = arith.constant 0 : index
    %c0_2 = arith.constant 0 : index
    %7 = vector.load %arg2[%c0_1, %c0_2] : memref<495x128xf32, #tpu.memory_space<vmem>>, vector<495x128xf32>
    %cst = arith.constant dense<0.000000e+00> : vector<4x128xf32>
    %8 = tpu.matmul %6, %7, %cst {dimension_numbers = #tpu.dot_dimension_numbers<[1], [0], [0], [1], [0, 0, 1, 1], [], []>} : vector<4x495xf32>, vector<495x128xf32>, vector<4x128xf32> -> vector<4x128xf32>
    %c0_3 = arith.constant 0 : index
    %c0_4 = arith.constant 0 : index
    %9 = vector.load %arg3[%c0_3, %c0_4] : memref<4x128xf32, #tpu.memory_space<vmem>>, vector<4x128xf32>
    tpu.vector_store %arg3[%c0_3, %c0_4], %8 {strides = array<i32>} : memref<4x128xf32, #tpu.memory_space<vmem>>, vector<4x128xf32>,
    return
  }
  func.func @transform_0(%arg0: i32) -> (i32, i32) {
    %c0_i32 = arith.constant 0 : i32
    %c0_i32_0 = arith.constant 0 : i32
    return %arg0, %c0_i32 : i32, i32
  }
  func.func @transform_1(%arg0: i32) -> (i32, i32) {
    %c0_i32 = arith.constant 0 : i32
    %c0_i32_0 = arith.constant 0 : i32
    %c0_i32_1 = arith.constant 0 : i32
    return %c0_i32, %c0_i32_0 : i32, i32
  }
  func.func @transform_2(%arg0: i32) -> (i32, i32) {
    %c0_i32 = arith.constant 0 : i32
    %c0_i32_0 = arith.constant 0 : i32
    return %arg0, %c0_i32 : i32, i32
  }
}

</mosaic_0001>

<bundles_post_ra>
// kernel: tpu_custom_call.1
= control target key start
LH: loop header
LB: loop body
LE: loop exit
PB: predicated region body
PF: predicated region fallthrough
CT: control target
= control target key end

     0   :  { %7 = vsyncpa [#allocation3], 0  ;;  %s389_s0 = inlined_call_operand.hbm [shape: f32[4,512], index: 0, kind: input, shape index: {}]   ;;  %s390_s1 = inlined_call_operand.hbm [shape: f32[495,128], index: 1, kind: input, shape index: {}]   ;;  %s391_s2 = inlined_call_operand.hbm [shape: f32[4,128], index: 2, kind: output, shape index: {}]  }
   0x1   :  { %8 = vsyncpa [#allocation6], 0 }
   0x2   :  { %9 = vsyncpa [#allocation4], 0  ;;  %s15_s11 = sshll.u32 %s389_s0, 4  ;;  %s344_s12 = smov [#allocation2]   ;;  %s16_s11 = int_to_ptr.hbm [resolvable:$true] %s15_s11 }
   0x3   :  { %s17_s13 = sshll.u32 %s344_s12, 4  ;;  %s25_s16 = sshll.u32 %s390_s1, 4  ;;  %s18_s13 = int_to_ptr.vmem [resolvable:$true] %s17_s13  ;;  %s26_s16 = int_to_ptr.hbm [resolvable:$true] %s25_s16 }
   0x4   :  { %20 = dma.hbm_to_vmem [thread:$0]  %s16_s11, 256, %s18_s13, [#allocation3]  }
   0x5   :  { %s345_s17 = smov [#allocation5]   ;;  %s346_s19 = smov 128  }
   0x6   :  { %s27_s18 = sshll.u32 %s345_s17, 4  ;;  %s347_s20 = smov 8   ;;  %s28_s18 = int_to_ptr.vmem [resolvable:$true] %s27_s18 }
   0x7   :  { %33 = dma.hbm_to_vmem [thread:$0]  %s26_s16, 7936, %s28_s18, [#allocation6], %s346_s19, %s346_s19, %s347_s20  }
   0x8   :  { %338 = dma.done.wait [#allocation3], 256  }
   0x9   :  { %339 = vsyncadd [#allocation3], 4294967040 }
   0xa   :  { %340 = dma.done.wait [#allocation6], 7936  }
   0xb   :  { %341 = vsyncadd [#allocation6], 4294959360  ;;  %v43_v0 = vld [vmem:[#allocation2 + $0x8] sm:$0xff]  ;;  %s348_s0 = smov 112   ;;  %v372_v1 = vld [vmem:[#allocation2] sm:$0xff]  ;;  %vm154_vm0 = vcmask 1046528  }
   0xc   :  { %48 = vrot.lane.b32.xlu0 %v43_v0, %s348_s0  ;;  %v124_v2 = vld [vmem:[#allocation5 + $0x178] sm:$0xff]  ;;  %v123_v3 = vld [vmem:[#allocation5 + $0x170] sm:$0xff]  ;;  %v138_v4 = vld [vmem:[#allocation5 + $0x1e8] sm:$0x7f]  ;;  %vm54_vm1 = vcmask 916480   ;;  %s349_s1 = smov 127  }
   0xd   :  { %198 = vmatpush.msra.mxu2 %v124_v2  ;;  %v137_v5 = vld [vmem:[#allocation5 + $0x1e0] sm:$0xff]  ;;  %v122_v6 = vld [vmem:[#allocation5 + $0x168] sm:$0xff]  ;;  %257 = vmatpush.msk.msra.mxu3 %vm154_vm0, %v138_v4  ;;  %v92_v7 = vld [vmem:[#allocation5 + $0x78] sm:$0xff]  ;;  %vm52_vm2 = vcmask 1043456   ;;  %vm70_vm3 = vcmask 1039360   ;;  %vm151_vm4 = vcmask 908288  }
   0xe   :  { %v136_v8 = vld [vmem:[#allocation5 + $0x1d8] sm:$0xff]  ;;  %158 = vmatpush.msra.mxu0 %v92_v7  ;;  %v121_v10 = vld [vmem:[#allocation5 + $0x160] sm:$0xff]  ;;  %v91_v11 = vld [vmem:[#allocation5 + $0x70] sm:$0xff]  ;;  %s350_s21 = smov [#allocation7]   ;;  %s246_s25 = sshll.u32 %s391_s2, 4  ;;  %s247_s25 = int_to_ptr.hbm [resolvable:$true] %s246_s25 }
   0xf   :  { %199 = vmatpush.msra.mxu2 %v123_v3  ;;  %v108_v9 = vld [vmem:[#allocation5 + $0xf8] sm:$0xff]  ;;  %221 = vmatpush.msra.mxu3 %v137_v5  ;;  %v107_v12 = vld [vmem:[#allocation5 + $0xf0] sm:$0xff]  ;;  %v90_v14 = vld [vmem:[#allocation5 + $0x68] sm:$0xff]  ;;  %s244_s22 = sshll.u32 %s350_s21, 4  ;;  %s245_s22 = int_to_ptr.vmem [resolvable:$true] %s244_s22 }
  0x10   :  { %178 = vmatpush.msra.mxu1 %v108_v9  ;;  %v135_v13 = vld [vmem:[#allocation5 + $0x1d0] sm:$0xff]  ;;  %159 = vmatpush.msra.mxu0 %v91_v11  ;;  %v106_v15 = vld [vmem:[#allocation5 + $0xe8] sm:$0xff]  ;;  %v120_v16 = vld [vmem:[#allocation5 + $0x158] sm:$0xff] }
  0x11   :  { %200 = vmatpush.msra.mxu2 %v122_v6  ;;  %222 = vmatpush.msra.mxu3 %v136_v8  ;;  %v89_v17 = vld [vmem:[#allocation5 + $0x60] sm:$0xff]  ;;  %v134_v18 = vld [vmem:[#allocation5 + $0x1c8] sm:$0xff]  ;;  %v119_v20 = vld [vmem:[#allocation5 + $0x150] sm:$0xff] }
  0x12   :  { %179 = vmatpush.msra.mxu1 %v107_v12  ;;  %160 = vmatpush.msra.mxu0 %v90_v14  ;;  %v105_v19 = vld [vmem:[#allocation5 + $0xe0] sm:$0xff]  ;;  %v118_v22 = vld [vmem:[#allocation5 + $0x148] sm:$0xff]  ;;  %v132_v23 = vld [vmem:[#allocation5 + $0x1b8] sm:$0xff] }
  0x13   :  { %201 = vmatpush.msra.mxu2 %v121_v10  ;;  %223 = vmatpush.msra.mxu3 %v135_v13  ;;  %v133_v21 = vld [vmem:[#allocation5 + $0x1c0] sm:$0xff]  ;;  %v116_v25 = vld [vmem:[#allocation5 + $0x138] sm:$0xff]  ;;  %v115_v37 = vld [vmem:[#allocation5 + $0x130] sm:$0xff] }
  0x14   :  { %46 = vrot.lane.b32.xlu0 %v372_v1, %s348_s0  ;;  %180 = vmatpush.msra.mxu1 %v106_v15  ;;  %v117_v24 = vld [vmem:[#allocation5 + $0x140] sm:$0xff]  ;;  %v88_v35 = vld [vmem:[#allocation5 + $0x58] sm:$0xff]  ;;  %v131_v38 = vld [vmem:[#allocation5 + $0x1b0] sm:$0xff] }
  0x15   :  { %202 = vmatpush.msra.mxu2 %v120_v16  ;;  %161 = vmatpush.msra.mxu0 %v89_v17  ;;  %v104_v36 = vld [vmem:[#allocation5 + $0xd8] sm:$0xff]  ;;  %v87_v39 = vld [vmem:[#allocation5 + $0x50] sm:$0xff]  ;;  %v114_v41 = vld [vmem:[#allocation5 + $0x128] sm:$0xff] }
  0x16   :  { %224 = vmatpush.msra.mxu3 %v134_v18  ;;  %181 = vmatpush.msra.mxu1 %v105_v19  ;;  %v103_v40 = vld [vmem:[#allocation5 + $0xd0] sm:$0xff]  ;;  %v130_v42 = vld [vmem:[#allocation5 + $0x1a8] sm:$0xff]  ;;  %v113_v45 = vld [vmem:[#allocation5 + $0x120] sm:$0xff] }
  0x17   :  { %203 = vmatpush.msra.mxu2 %v119_v20  ;;  %162 = vmatpush.msra.mxu0 %v88_v35  ;;  %v86_v43 = vld [vmem:[#allocation5 + $0x48] sm:$0xff]  ;;  %v129_v46 = vld [vmem:[#allocation5 + $0x1a0] sm:$0xff]  ;;  %v112_v49 = vld [vmem:[#allocation5 + $0x118] sm:$0xff] }
  0x18   :  { %225 = vmatpush.msra.mxu3 %v133_v21  ;;  %182 = vmatpush.msra.mxu1 %v104_v36  ;;  %v102_v44 = vld [vmem:[#allocation5 + $0xc8] sm:$0xff]  ;;  %v85_v47 = vld [vmem:[#allocation5 + $0x40] sm:$0xff]  ;;  %v128_v50 = vld [vmem:[#allocation5 + $0x198] sm:$0xff] }
  0x19   :  { %204 = vmatpush.msra.mxu2 %v118_v22  ;;  %163 = vmatpush.msra.mxu0 %v87_v39  ;;  %v101_v48 = vld [vmem:[#allocation5 + $0xc0] sm:$0xff]  ;;  %v84_v51 = vld [vmem:[#allocation5 + $0x38] sm:$0xff]  ;;  %v111_v53 = vld [vmem:[#allocation5 + $0x110] sm:$0xff] }
  0x1a   :  { %226 = vmatpush.msra.mxu3 %v132_v23  ;;  %183 = vmatpush.msra.mxu1 %v103_v40  ;;  %v100_v52 = vld [vmem:[#allocation5 + $0xb8] sm:$0xff]  ;;  %v127_v54 = vld [vmem:[#allocation5 + $0x190] sm:$0xff]  ;;  %v110_v57 = vld [vmem:[#allocation5 + $0x108] sm:$0xff] }
  0x1b   :  { %205 = vmatpush.msra.mxu2 %v117_v24  ;;  %164 = vmatpush.msra.mxu0 %v86_v43  ;;  %v83_v55 = vld [vmem:[#allocation5 + $0x30] sm:$0xff]  ;;  %v126_v58 = vld [vmem:[#allocation5 + $0x188] sm:$0xff]  ;;  %v109_v61 = vld [vmem:[#allocation5 + $0x100] sm:$0xff] }
  0x1c   :  { %227 = vmatpush.msra.mxu3 %v131_v38  ;;  %184 = vmatpush.msra.mxu1 %v102_v44  ;;  %v99_v56 = vld [vmem:[#allocation5 + $0xb0] sm:$0xff]  ;;  %v82_v59 = vld [vmem:[#allocation5 + $0x28] sm:$0xff]  ;;  %v125_v62 = vld [vmem:[#allocation5 + $0x180] sm:$0xff] }
  0x1d   :  { %206 = vmatpush.msra.mxu2 %v116_v25  ;;  %165 = vmatpush.msra.mxu0 %v85_v47  ;;  %v98_v60 = vld [vmem:[#allocation5 + $0xa8] sm:$0xff]  ;;  %v81_v63 = vld [vmem:[#allocation5 + $0x20] sm:$0xff]  ;;  %v96_v2 = vld [vmem:[#allocation5 + $0x98] sm:$0xff] }
  0x1e   :  { %228 = vmatpush.msra.mxu3 %v130_v42  ;;  %185 = vmatpush.msra.mxu1 %v101_v48  ;;  %v79_v3 = vld [vmem:[#allocation5 + $0x10] sm:$0xff]  ;;  %v78_v5 = vld [vmem:[#allocation5 + $0x8] sm:$0xff]  ;;  %v77_v7 = vld [vmem:[#allocation5] sm:$0xff] }
  0x1f   :  { %207 = vmatpush.msra.mxu2 %v115_v37  ;;  %166 = vmatpush.msra.mxu0 %v84_v51  ;;  %v95_v4 = vld [vmem:[#allocation5 + $0x90] sm:$0xff]  ;;  %v94_v6 = vld [vmem:[#allocation5 + $0x88] sm:$0xff]  ;;  %v93_v8 = vld [vmem:[#allocation5 + $0x80] sm:$0xff] }
  0x20   :  { %229 = vmatpush.msra.mxu3 %v129_v46  ;;  %186 = vmatpush.msra.mxu1 %v100_v52 }
  0x21   :  { %208 = vmatpush.msra.mxu2 %v114_v41  ;;  %167 = vmatpush.msra.mxu0 %v83_v55 }
  0x22   :  { %230 = vmatpush.msra.mxu3 %v128_v50  ;;  %187 = vmatpush.msra.mxu1 %v99_v56 }
  0x23   :  { %209 = vmatpush.msra.mxu2 %v113_v45  ;;  %168 = vmatpush.msra.mxu0 %v82_v59 }
  0x24   :  { %231 = vmatpush.msra.mxu3 %v127_v54  ;;  %188 = vmatpush.msra.mxu1 %v98_v60 }
  0x25   :  { %210 = vmatpush.msra.mxu2 %v112_v49  ;;  %169 = vmatpush.msra.mxu0 %v81_v63 }
  0x26   :  { %232 = vmatpush.msra.mxu3 %v126_v58 }
  0x27   :  { %211 = vmatpush.msra.mxu2 %v111_v53 }
  0x28   :  { %233 = vmatpush.msra.mxu3 %v125_v62 }
  0x29   :  { %212 = vmatpush.msra.mxu2 %v110_v57 }
  0x2b   :  { %213 = vmatpush.msra.mxu2 %v109_v61 }
  0x7e   :  { %v49_v26 = vpop.permute.xlu0 %48 }
  0x7f   :  { %v51_v27 = vrot.slane %v49_v26, 4 }
  0x81   :  { %v56_v28 = vsel %vm54_vm1, %v49_v26, %v51_v27 }
  0x82   :  { %v375_v29 = vmax.f32 %v43_v0, %v56_v28  ;;  %v97_v0 = vld [vmem:[#allocation5 + $0xa0] sm:$0xff] }
  0x83   :  { %189 = vmatpush.msra.mxu1 %v97_v0 }
  0x84   :  { %65 = vrot.lane.b32.xlu1 %v375_v29, %s349_s1 }
  0x85   :  { %190 = vmatpush.msra.mxu1 %v96_v2 }
  0x86   :  { %v47_v30 = vpop.permute.xlu0 %46 }
  0x87   :  { %v50_v31 = vrot.slane %v47_v30, 4  ;;  %191 = vmatpush.msra.mxu1 %v95_v4 }
  0x89   :  { %v53_v32 = vsel %vm52_vm2, %v50_v31, %v51_v27  ;;  %192 = vmatpush.msra.mxu1 %v94_v6 }
  0x8a   :  { %v55_v33 = vsel %vm54_vm1, %v47_v30, %v53_v32 }
  0x8b   :  { %v380_v34 = vmax.f32 %v372_v1, %v55_v33  ;;  %v80_v1 = vld [vmem:[#allocation5 + $0x18] sm:$0xff]  ;;  %193 = vmatpush.msra.mxu1 %v93_v8 }
  0x8c   :  { %170 = vmatpush.msra.mxu0 %v80_v1 }
  0x8d   :  { %63 = vrot.lane.b32.xlu1 %v380_v34, %s349_s1 }
  0x8e   :  { %171 = vmatpush.msra.mxu0 %v79_v3 }
  0x90   :  { %172 = vmatpush.msra.mxu0 %v78_v5 }
  0x92   :  { %173 = vmatpush.msra.mxu0 %v77_v7 }
  0xf6   :  { %v66_v9 = vpop.permute.xlu1 %65 }
  0xf7   :  { %v68_v10 = vrot.slane %v66_v9, 4 }
  0xf9   :  { %v72_v11 = vsel %vm70_vm3, %v66_v9, %v68_v10 }
  0xfa   :  { %v76_v12 = vmax.f32 %v375_v29, %v72_v11 }
  0xfc   :  { %143 = vst [vmem:[#allocation1 + $0x10] ss:$2 sm:$0xff] %v76_v12 }
  0xff   :  { %v64_v13 = vpop.permute.xlu1 %63 }
 0x100   :  { %v67_v14 = vrot.slane %v64_v13, 4 }
 0x102   :  { %v69_v15 = vsel %vm52_vm2, %v67_v14, %v68_v10 }
 0x103   :  { %v71_v16 = vsel %vm70_vm3, %v64_v13, %v69_v15  ;;  %v146_v17 = vld.sshfl [vmem:[#allocation1 + $0x10] sm:$0xff pattern:$0x75316420]  ;;  %v147_v18 = vld.sshfl [vmem:[#allocation1 + $0x18] sm:$0xff pattern:$0x75316420] }
 0x104   :  { %v75_v19 = vmax.f32 %v380_v34, %v71_v16  ;;  %214 = vmatmul.f32.vlgmr.msra.gmra.mxu2 %v146_v17  ;;  %258 = vmatmul.msk.f32.vlgmr.msra.gmra.mxu3 %vm151_vm4, %v147_v18 }
 0x106   :  { %141 = vst [vmem:[#allocation1] ss:$2 sm:$0xff] %v75_v19 }
 0x10d   :  { %v144_v20 = vld.sshfl [vmem:[#allocation1] sm:$0xff pattern:$0x75316420]  ;;  %v145_v21 = vld.sshfl [vmem:[#allocation1 + $0x8] sm:$0xff pattern:$0x75316420] }
 0x10e   :  { %174 = vmatmul.f32.vlgmr.msra.gmra.mxu0 %v144_v20  ;;  %194 = vmatmul.f32.vlgmr.msra.gmra.mxu1 %v145_v21 }
 0x187   :  { %v215_v25 = vpop.f32.mrf.mxu2  ;;  %v235_v27 = vpop.f32.mrf.mxu3 }
 0x18b   :  { %v175_v22 = vpop.f32.mrf.mxu0  ;;  %v195_v23 = vpop.f32.mrf.mxu1 }
 0x18c   :  { %v196_v24 = vadd.f32 %v195_v23, %v175_v22 }
 0x18e   :  { %v216_v26 = vadd.f32 %v215_v25, %v196_v24 }
 0x190   :  { %v236_v28 = vadd.f32 %v235_v27, %v216_v26 }
 0x192   :  { %238 = vst [vmem:[#allocation7] sm:$0xf] %v236_v28 }
 0x193   :  { %249 = dma.vmem_to_hbm [thread:$0]  %s245_s22, 64, %s247_s25, [#allocation4]  }
 0x194   :  { %342 = dma.done.wait [#allocation4], 64  }
 0x195   :  { %343 = vsyncadd [#allocation4], 4294967232 }
 0x196   :  { %254 = vsyncpa [#allocation3], 1 }
 0x197   :  { %255 = vsyncpa [#allocation6], 1 }
 0x198   :  { %256 = vsyncpa [#allocation4], 1 }

</bundles_post_ra>
